<compile_context>
chip_gen: v5e
topology: v5e:2x2
jax: 0.10.0
libtpu: 0.0.40
codegen_flags: <defaults>
</compile_context>

<pallas_src>
import functools

import jax
import jax.numpy as jnp
from jax import lax
from jax.experimental import pallas as pl
from jax.experimental.pallas import tpu as pltpu

_LANE_CHUNK = 512          # in-kernel sub-tile width (lanes)


def _conv1x1_where_kernel(x_ref, w_ref, b_ref, param_ref, o_ref):
    # x_ref:     (Cin,  TP)  VMEM, pixels on lanes
    # w_ref:     (Cout, Cin) VMEM
    # b_ref:     (Cout, 1)   VMEM
    # param_ref: (1,)        SMEM scalar
    # o_ref:     (Cout, TP)  VMEM, lane-dense output tile
    cin, tp = x_ref.shape

    fill = param_ref[0] * jnp.float32(-1.01)
    w = w_ref[...]                                   # (Cout, Cin)
    b = b_ref[...]                                   # (Cout, 1)
    w_cols = [w[:, c:c + 1] for c in range(cin)]     # hoisted (Cout, 1) columns

    def compute_chunk(off, size):
        # dense (Cout, size) broadcast-FMAs on the VPU (no MXU for a 3x8 GEMM)
        acc = x_ref[0:1, pl.ds(off, size)] * w_cols[0]
        for c in range(1, cin):
            acc = acc + x_ref[c:c + 1, pl.ds(off, size)] * w_cols[c]
        acc = acc + b
        # single dense (Cout, size) store (v5e has one vector-store slot)
        o_ref[:, pl.ds(off, size)] = jnp.where(acc > 0.0, acc, fill).astype(o_ref.dtype)

    chunk = min(_LANE_CHUNK, tp)
    n_full = tp // chunk
    if n_full > 1:
        def body(i, carry):
            compute_chunk(pl.multiple_of(i * chunk, chunk), chunk)
            return carry
        lax.fori_loop(0, n_full, body, 0, unroll=4)
    else:
        compute_chunk(0, chunk)
    rem = tp - n_full * chunk                        # only for tiny full-width tiles
    if rem:
        compute_chunk(n_full * chunk, rem)


@functools.partial(jax.jit, static_argnames=("tp_cap",))
def model_forward(x_nchw, w_oihw, bias, param, *, tp_cap=65536):
    N, Cin, H, W = x_nchw.shape
    Cout = w_oihw.shape[0]
    Ho, Wo = H + 2, W + 2
    P = Ho * Wo

    # Single wrapper-side HBM pass: spatial zero-padding (padding=1) of the
    # small Cin=3 input; NCHW -> (N, Cin, P) reshape is free.
    x3 = jnp.pad(x_nchw, ((0, 0), (0, 0), (1, 1), (1, 1))).reshape(N, Cin, P)

    w2 = w_oihw.reshape(Cout, Cin).astype(jnp.float32)       # (Cout, Cin)
    b2 = bias.astype(jnp.float32).reshape(Cout, 1)           # (Cout, 1)
    p1 = jnp.reshape(param.astype(jnp.float32), (1,))        # (1,)

    # Pixel-axis tile: multiple of the in-kernel lane chunk; sized so each
    # grid step moves ~MBs of HBM traffic for big images while keeping >= ~4
    # steps (v7x two-TC sharding).  Tiny images use one full-width block.
    if P <= 2 * _LANE_CHUNK:
        tp = P
    else:
        tp = min(tp_cap, max(P // 4, _LANE_CHUNK))
        tp = max(_LANE_CHUNK, (tp // _LANE_CHUNK) * _LANE_CHUNK)

    grid = (N, pl.cdiv(P, tp))

    out3 = pl.pallas_call(
        _conv1x1_where_kernel,
        out_shape=jax.ShapeDtypeStruct((N, Cout, P), jnp.float32),
        grid=grid,
        in_specs=[
            pl.BlockSpec((None, Cin, tp), lambda n, j: (n, 0, j)),    # x tile
            pl.BlockSpec((Cout, Cin), lambda n, j: (0, 0)),           # weight (VMEM)
            pl.BlockSpec((Cout, 1), lambda n, j: (0, 0)),             # bias   (VMEM)
            pl.BlockSpec(memory_space=pltpu.MemorySpace.SMEM),        # param scalar
        ],
        out_specs=pl.BlockSpec((None, Cout, tp), lambda n, j: (n, 0, j)),
        # <= ~2.75 MB of double-buffered tiles per step even at tp_cap, so the
        # default scoped VMEM limit is fine on v5e/v6e/v7x (no vmem_limit_bytes).
        compiler_params=pltpu.CompilerParams(
            dimension_semantics=("parallel", "parallel")),
    )(x3, w2, b2, p1)

    # Free reshape straight back to NCHW (no slice, no transpose).
    return out3.reshape(N, Cout, Ho, Wo)


def _reference(x, w, b, param):
    Cout, Cin = w.shape[0], w.shape[1]
    xp = jnp.pad(x, ((0, 0), (0, 0), (1, 1), (1, 1)))
    v1 = jnp.einsum("nchw,oc->nohw", xp, w.reshape(Cout, Cin)) + b.reshape(1, Cout, 1, 1)
    return jnp.where(v1 > 0, v1, param * -1.01)


if __name__ == "__main__":
    key = jax.random.PRNGKey(0)
    kx, kw, kb, kx2 = jax.random.split(key, 4)

    Cin, Cout = 3, 8            # fixed by Conv2d(3, 8, 1)
    w = jax.random.normal(kw, (Cout, Cin, 1, 1), dtype=jnp.float32) * 0.1
    b = jax.random.normal(kb, (Cout,), dtype=jnp.float32) * 0.1
    param = jnp.float32(-1.0)   # nn.Parameter(torch.tensor(-1, dtype=torch.float))

    # small shape (single full-width pixel-block path)
    x_small = jax.random.normal(kx, (2, Cin, 16, 16), dtype=jnp.float32)
    out_small = jax.block_until_ready(model_forward(x_small, w, b, param))
    ref_small = _reference(x_small, w, b, param)
    assert out_small.shape == (2, Cout, 18, 18)
    assert jnp.allclose(out_small, ref_small, atol=1e-5, rtol=1e-5)

    # module's own shape (multi-block + chunked-lane + ragged-tail path)
    x_spec = jax.random.normal(kx2, (1, Cin, 64, 64), dtype=jnp.float32)
    out_spec = jax.block_until_ready(model_forward(x_spec, w, b, param))
    ref_spec = _reference(x_spec, w, b, param)
    assert out_spec.shape == (1, Cout, 66, 66)
    assert jnp.allclose(out_spec, ref_spec, atol=1e-5, rtol=1e-5)

    print("KERNEL_OK")
</pallas_src>

<mosaic_0001>
module attributes {stable_mosaic.version = 11 : i64} {
  func.func @_conv1x1_where_kernel(%arg0: i32, %arg1: i32, %arg2: memref<1x3x324xf32, #tpu.memory_space<vmem>>, %arg3: memref<8x3xf32, #tpu.memory_space<vmem>>, %arg4: memref<8x1xf32, #tpu.memory_space<vmem>>, %arg5: memref<1xf32, #tpu.memory_space<smem>>, %arg6: memref<1x8x324xf32, #tpu.memory_space<vmem>>) attributes {dimension_semantics = [#tpu.dimension_semantics<parallel>, #tpu.dimension_semantics<parallel>], iteration_bounds = array<i64: 2, 1>, scalar_prefetch = 0 : i64, scratch_operands = 0 : i64, tpu.core_type = #tpu.core_type<tc>, window_params = [{transform_indices = @transform_0, window_bounds = array<i64: 1, 3, 324>}, {pipeline_mode = #tpu.pipeline_mode<synchronous>, transform_indices = @transform_1, window_bounds = array<i64: 8, 3>}, {pipeline_mode = #tpu.pipeline_mode<synchronous>, transform_indices = @transform_2, window_bounds = array<i64: 8, 1>}, {transform_indices = @transform_3, window_bounds = array<i64: 1>}, {transform_indices = @transform_4, window_bounds = array<i64: 1, 8, 324>}]} {
    %c0 = arith.constant 0 : index
    %0 = memref.load %arg5[%c0] : memref<1xf32, #tpu.memory_space<smem>>
    %cst = arith.constant -1.010000e+00 : f32
    %1 = arith.mulf %0, %cst : f32
    %c0_0 = arith.constant 0 : index
    %c0_1 = arith.constant 0 : index
    %2 = vector.load %arg3[%c0_0, %c0_1] : memref<8x3xf32, #tpu.memory_space<vmem>>, vector<8x3xf32>
    %c0_2 = arith.constant 0 : index
    %c0_3 = arith.constant 0 : index
    %3 = vector.load %arg4[%c0_2, %c0_3] : memref<8x1xf32, #tpu.memory_space<vmem>>, vector<8x1xf32>
    %4 = vector.extract_strided_slice %2 {offsets = [0, 0], sizes = [8, 1], strides = [1, 1]} : vector<8x3xf32> to vector<8x1xf32>
    %5 = vector.extract_strided_slice %2 {offsets = [0, 1], sizes = [8, 1], strides = [1, 1]} : vector<8x3xf32> to vector<8x1xf32>
    %6 = vector.extract_strided_slice %2 {offsets = [0, 2], sizes = [8, 1], strides = [1, 1]} : vector<8x3xf32> to vector<8x1xf32>
    %c0_4 = arith.constant 0 : index
    %c0_5 = arith.constant 0 : index
    %c0_6 = arith.constant 0 : index
    %7 = vector.load %arg2[%c0_4, %c0_5, %c0_6] : memref<1x3x324xf32, #tpu.memory_space<vmem>>, vector<1x1x324xf32>
    %8 = vector.shape_cast %7 : vector<1x1x324xf32> to vector<1x324xf32>
    %9 = vector.broadcast %8 : vector<1x324xf32> to vector<8x324xf32>
    %10 = vector.broadcast %4 : vector<8x1xf32> to vector<8x324xf32>
    %11 = arith.mulf %9, %10 : vector<8x324xf32>
    %c0_7 = arith.constant 0 : index
    %c1 = arith.constant 1 : index
    %c0_8 = arith.constant 0 : index
    %12 = vector.load %arg2[%c0_7, %c1, %c0_8] : memref<1x3x324xf32, #tpu.memory_space<vmem>>, vector<1x1x324xf32>
    %13 = vector.shape_cast %12 : vector<1x1x324xf32> to vector<1x324xf32>
    %14 = vector.broadcast %13 : vector<1x324xf32> to vector<8x324xf32>
    %15 = vector.broadcast %5 : vector<8x1xf32> to vector<8x324xf32>
    %16 = arith.mulf %14, %15 : vector<8x324xf32>
    %17 = arith.addf %11, %16 : vector<8x324xf32>
    %c0_9 = arith.constant 0 : index
    %c2 = arith.constant 2 : index
    %c0_10 = arith.constant 0 : index
    %18 = vector.load %arg2[%c0_9, %c2, %c0_10] : memref<1x3x324xf32, #tpu.memory_space<vmem>>, vector<1x1x324xf32>
    %19 = vector.shape_cast %18 : vector<1x1x324xf32> to vector<1x324xf32>
    %20 = vector.broadcast %19 : vector<1x324xf32> to vector<8x324xf32>
    %21 = vector.broadcast %6 : vector<8x1xf32> to vector<8x324xf32>
    %22 = arith.mulf %20, %21 : vector<8x324xf32>
    %23 = arith.addf %17, %22 : vector<8x324xf32>
    %24 = vector.broadcast %3 : vector<8x1xf32> to vector<8x324xf32>
    %25 = arith.addf %23, %24 : vector<8x324xf32>
    %cst_11 = arith.constant 0.000000e+00 : f32
    %26 = vector.broadcast %cst_11 : f32 to vector<8x324xf32>
    %27 = arith.cmpf ogt, %25, %26 : vector<8x324xf32>
    %28 = vector.broadcast %1 : f32 to vector<8x324xf32>
    %29 = arith.select %27, %25, %28 : vector<8x324xi1>, vector<8x324xf32>
    %c0_12 = arith.constant 0 : index
    %c0_13 = arith.constant 0 : index
    %c0_14 = arith.constant 0 : index
    %30 = vector.load %arg6[%c0_12, %c0_13, %c0_14] : memref<1x8x324xf32, #tpu.memory_space<vmem>>, vector<1x8x324xf32>
    %31 = vector.shape_cast %30 : vector<1x8x324xf32> to vector<8x324xf32>
    %32 = vector.shape_cast %29 : vector<8x324xf32> to vector<1x8x324xf32>
    tpu.vector_store %arg6[%c0_12, %c0_13, %c0_14], %32 {strides = array<i32>} : memref<1x8x324xf32, #tpu.memory_space<vmem>>, vector<1x8x324xf32>,
    return
  }
  func.func @transform_0(%arg0: i32, %arg1: i32) -> (i32, i32, i32) {
    %c0_i32 = arith.constant 0 : i32
    %c0_i32_0 = arith.constant 0 : i32
    return %arg0, %c0_i32, %arg1 : i32, i32, i32
  }
  func.func @transform_1(%arg0: i32, %arg1: i32) -> (i32, i32) {
    %c0_i32 = arith.constant 0 : i32
    %c0_i32_0 = arith.constant 0 : i32
    %c0_i32_1 = arith.constant 0 : i32
    return %c0_i32, %c0_i32_0 : i32, i32
  }
  func.func @transform_2(%arg0: i32, %arg1: i32) -> (i32, i32) {
    %c0_i32 = arith.constant 0 : i32
    %c0_i32_0 = arith.constant 0 : i32
    %c0_i32_1 = arith.constant 0 : i32
    return %c0_i32, %c0_i32_0 : i32, i32
  }
  func.func @transform_3(%arg0: i32, %arg1: i32) -> i32 {
    %c0_i32 = arith.constant 0 : i32
    %c0_i32_0 = arith.constant 0 : i32
    return %c0_i32 : i32
  }
  func.func @transform_4(%arg0: i32, %arg1: i32) -> (i32, i32, i32) {
    %c0_i32 = arith.constant 0 : i32
    %c0_i32_0 = arith.constant 0 : i32
    return %arg0, %c0_i32, %arg1 : i32, i32, i32
  }
}

</mosaic_0001>

<bundles_post_ra>
// kernel: model_forward.1
= control target key start
LH: loop header
LB: loop body
LE: loop exit
PB: predicated region body
PF: predicated region fallthrough
CT: control target
= control target key end

     0   :  { %s502_s17 = smov 0   ;;  %s504_s18 = smov 0   ;;  %s548_s0 = inlined_call_operand.vmem [shape: f32[2,3,324], index: 0, kind: input, shape index: {}]   ;;  %s549_s1 = inlined_call_operand.vmem [shape: f32[8,3], index: 1, kind: input, shape index: {}]   ;;  %s550_s2 = inlined_call_operand.vmem [shape: f32[8,1], index: 2, kind: input, shape index: {}]   ;;  %s551_s3 = inlined_call_operand.<no memory space> [shape: f32[1], index: 3, kind: input, shape index: {}]   ;;  %s552_s4 = inlined_call_operand.vmem [shape: f32[2,8,324], index: 4, kind: output, shape index: {}]  }
   0x1   :  { %9 = sst [smem:[#allocation2]] %s551_s3  ;;  %s506_s19 = smov 0  }
   0x2 LB: > { %s27_s3 = sadd.s32 1, %s465_s18  ;;  %p406_p0 = scmp.ge.s32.totalorder %s469_s19, 1  ;;  %s469_s19 = sphi %s506_s19, %s15_s19   ;;  %s465_s18 = sphi %s504_s18, %s554_s18   ;;  %s461_s17 = sphi %s502_s17, %s553_s17  }
   0x3   : > { %p29_p1 = scmp.ge.s32.totalorder %s27_s3, 2  ;;  %p184_p2 = scmp.lt.s32.totalorder %s469_s19, 3 }
   0x5   : > { %s556_s3 = smov (%p29_p1, %s27_s3), 0  ;;  %p185_p3 = pnand %p406_p0, %p184_p2 }
   0x6   : > { %p219_p4 = scmp.lt.s32.totalorder (!%p185_p3), %s461_s17, 1  ;;  %s532_s28 = sld [smem:[#allocation2]] (!%p185_p3) }
   0x7   : > { %188 = sbr.rel (%p185_p3) target bundleno = 151 (0x97), region = 36 }
   0xc   : > { %v240_v0 = vld [vmem:[%s549_s1] sm:$0xff]  ;;  %v471_v1 = vmov 0   ;;  %v472_v2 = vmov 2   ;;  %v473_v4 = vmov 1   ;;  %s558_s17 = smov (!%p219_p4, %s461_s17), 1  ;;  %vm313_vm3 = vcmask 556032  }
   0xd   : > { %442 = vset.pattern.permute.xlu0 %v471_v1  ;;  %444 = vset.pattern.permute.xlu1 %v472_v2  ;;  %v241_v3 = vld [vmem:[%s550_s2] sm:$0xff]  ;;  %s413_s24 = smul.u32 12, %s558_s17 }
   0xe   : > { %252 = vperm.xlu0 %442, %v240_v0   ;;  %287 = vperm.xlu1 %444, %v240_v0   ;;  %s239_s29 = smul.f32 -1.01, %s532_s28 }
   0xf   : > { %s226_s27 = scalar_lea.vmem %s548_s0, %s413_s24  ;;  %s414_s30 = smul.u32 24, %s558_s17 }
  0x10   : > { %v242_v6 = vld [vmem:[%s226_s27] ss:$4 sm:$0x7]  ;;  %v409_v8 = vld [vmem:[%s226_s27 + $0x1] ss:$4 sm:$0x7]  ;;  %v307_v39 = vstv %s239_s29 }
  0x11   : > { %v410_v9 = vld [vmem:[%s226_s27 + $0x2] ss:$4 sm:$0x7]  ;;  %v244_v10 = vperm.slane %v242_v6, 0  ;;  %v245_v11 = vperm.slane %v242_v6, 1  ;;  %v246_v12 = vperm.slane %v242_v6, 2  ;;  %s236_s7 = scalar_lea.vmem %s552_s4, %s414_s30 }
  0x12   : > { %v261_v13 = vperm.slane %v409_v8, 0  ;;  %v262_v14 = vperm.slane %v409_v8, 1  ;;  %v263_v15 = vperm.slane %v409_v8, 2  ;;  %v280_v16 = vperm.slane %v410_v9, 0 }
  0x13   : > { %v281_v17 = vperm.slane %v410_v9, 1  ;;  %v282_v18 = vperm.slane %v410_v9, 2 }
  0x16   : > { %443 = vset.pattern.permute.xlu0 %v473_v4  ;;  %445 = vset.pattern.permute.xlu1 %v471_v1 }
  0x17   : > { %268 = vperm.xlu0 %443, %v240_v0   ;;  %298 = vperm.xlu1 %445, %v241_v3  }
  0x1f   : > { %446 = vset.pattern.permute.xlu0 %v471_v1 }
  0x80   : > { %v253_v5 = vpop.permute.xlu0 %252  ;;  %v288_v7 = vpop.permute.xlu1 %287 }
  0x81   : > { %v255_v19 = vmul.f32 %v253_v5, %v244_v10  ;;  %v256_v20 = vmul.f32 %v253_v5, %v245_v11  ;;  %v257_v22 = vmul.f32 %v253_v5, %v246_v12  ;;  %v290_v26 = vmul.f32 %v288_v7, %v280_v16 }
  0x82   : > { %v291_v27 = vmul.f32 %v288_v7, %v281_v17  ;;  %v292_v28 = vmul.f32 %v288_v7, %v282_v18 }
  0x89   : > { %v269_v21 = vpop.permute.xlu0 %268  ;;  %v299_v32 = vpop.permute.xlu1 %298 }
  0x8a   : > { %v271_v23 = vmul.f32 %v269_v21, %v261_v13  ;;  %v272_v24 = vmul.f32 %v269_v21, %v262_v14  ;;  %v273_v25 = vmul.f32 %v269_v21, %v263_v15 }
  0x8c   : > { %v274_v29 = vadd.f32 %v271_v23, %v255_v19  ;;  %v275_v30 = vadd.f32 %v272_v24, %v256_v20  ;;  %v276_v31 = vadd.f32 %v273_v25, %v257_v22 }
  0x8e   : > { %v293_v33 = vadd.f32 %v290_v26, %v274_v29  ;;  %v294_v34 = vadd.f32 %v291_v27, %v275_v30  ;;  %v295_v35 = vadd.f32 %v292_v28, %v276_v31 }
  0x90   : > { %v301_v36 = vadd.f32 %v299_v32, %v293_v33  ;;  %v302_v37 = vadd.f32 %v299_v32, %v294_v34  ;;  %v303_v38 = vadd.f32 %v299_v32, %v295_v35 }
  0x92   : > { %vm304_vm0 = vcmp.gt.f32.partialorder %v301_v36, 0.0  ;;  %vm305_vm1 = vcmp.gt.f32.partialorder %v302_v37, 0.0  ;;  %vm306_vm2 = vcmp.gt.f32.partialorder %v303_v38, 0.0 }
  0x93   : > { %v308_v40 = vsel %vm304_vm0, %v301_v36, %v307_v39  ;;  %v309_v41 = vsel %vm305_vm1, %v302_v37, %v307_v39  ;;  %v310_v42 = vsel %vm306_vm2, %v303_v38, %v307_v39 }
  0x94   : > { %311 = vst [vmem:[%s236_s7] sm:$0xff] %v308_v40 }
  0x95   : > { %312 = vst [vmem:[%s236_s7 + $0x8] sm:$0xff] %v309_v41 }
  0x96   : > { %314 = vst.msk [vmem:[%s236_s7 + $0x10] sm:$0xff] %vm313_vm3, %v310_v42 }
  0x97 PF: > { %s15_s19 = sadd.s32 1, %s469_s19   ;;  %s553_s17 = smov %s465_s18 }
  0x98   : > { %p12_p5 = scmp.ge.s32.totalorder %s15_s19, 4   ;;  %s554_s18 = smov %s556_s3 }
  0x9a   :  { %14 = sbr.rel (!%p12_p5) target bundleno = 2 (0x2), region = 68 }

</bundles_post_ra>
